<compile_context>
chip_gen: v7x
topology: tpu7x:2x2x1
jax: 0.10.0
libtpu: 0.0.40
codegen_flags: <defaults>
</compile_context>

<pallas_src>
import jax
import jax.numpy as jnp
import numpy as np
from jax.experimental import pallas as pl
from jax.experimental.pallas import tpu as pltpu

tag2idx = {'<PAD>': 0, 'O': 1, 'T-NEG': 2, 'T-NEU': 3, 'T-POS': 4}

HIDDEN = 200       # hidden width of the first Linear
OUT_PAD = 128      # lane-dense padded output width
NEG_BIG = -1e30    # "minus infinity" bias for padded output lanes


def _round_up(x, m):
    return ((x + m - 1) // m) * m


def _fused_mlp_kernel(word_ref, x2_ref, emb_fold_ref, w1b_ref, b1_ref,
                      w2_ref, b2_ref, out_ref):
    tb = word_ref.shape[0]
    nw = emb_fold_ref.shape[0]

    # In-kernel embedding "gather": one-hot(word) @ emb_fold.
    # emb_fold = emb_table @ W1[:E] was folded offline; padding_idx row is 0.
    word = word_ref[...]                                        # (TB, 1) int32
    onehot = (jax.lax.broadcasted_iota(jnp.int32, (tb, nw), 1)
              == word).astype(jnp.float32)                      # (TB, NW_pad)

    # hidden = cat([x1, x2]) @ W1 + b1, with the embedding half pre-folded.
    h = (jnp.dot(onehot, emb_fold_ref[...], preferred_element_type=jnp.float32)
         + jnp.dot(x2_ref[...], w1b_ref[...], preferred_element_type=jnp.float32)
         + b1_ref[...])                                         # (TB, 200)

    # SiLU
    h = h * jax.nn.sigmoid(h)

    # Output layer (padded to OUT_PAD lanes; pad lanes get bias = -1e30).
    logits = (jnp.dot(h, w2_ref[...], preferred_element_type=jnp.float32)
              + b2_ref[...])                                    # (TB, OUT_PAD)

    # Softmax over the label axis; padded lanes underflow to exp(...) == 0.
    m = jnp.max(logits, axis=-1, keepdims=True)
    e = jnp.exp(logits - m)
    out_ref[...] = e * pl.reciprocal(jnp.sum(e, axis=-1, keepdims=True),
                                     approx=True)


def prepare_inference_params(params):
    """One-time preprocessing: fold embedding through W1[:E] and pad the head."""
    emb = params["embeddings"]                # (num_words, E), row 0 zeroed
    w1 = params["hidden_w"]                   # (E + L, 200)
    b1 = params["hidden_b"]                   # (200,)
    w2 = params["output_w"]                   # (200, L)
    b2 = params["output_b"]                   # (L,)

    num_words, E = emb.shape
    L = w2.shape[1]

    emb_fold = emb @ w1[:E, :]                # (num_words, 200)
    nw_pad = _round_up(max(num_words, 8), 128)
    emb_fold = jnp.zeros((nw_pad, HIDDEN), jnp.float32).at[:num_words].set(emb_fold)

    w2_pad = jnp.zeros((HIDDEN, OUT_PAD), jnp.float32).at[:, :L].set(w2)
    b2_pad = jnp.full((1, OUT_PAD), NEG_BIG, jnp.float32).at[0, :L].set(b2)

    return {
        "emb_fold": emb_fold,                 # (nw_pad, 200)
        "w1b": w1[E:, :],                     # (L, 200)  prev_label half of W1
        "b1": b1[None, :],                    # (1, 200)
        "w2": w2_pad,                         # (200, 128)
        "b2": b2_pad,                          # (1, 128)
        "num_labels": int(L),
    }


def random_init_embeddings_forward(word, prev_label, prep):
    """word: int32 (B,), prev_label: f32 (B, L). Returns f32 (B, L)."""
    B = word.shape[0]
    L = prep["num_labels"]
    nw_pad, H = prep["emb_fold"].shape

    # Batch tiling: big tiles pipeline well; small batches pad to a multiple of 8.
    tb = min(512, _round_up(B, 8))
    b_pad = _round_up(B, tb)

    word2 = jnp.zeros((b_pad, 1), jnp.int32).at[:B, 0].set(word.astype(jnp.int32))
    x2 = jnp.zeros((b_pad, L), jnp.float32).at[:B].set(prev_label.astype(jnp.float32))

    grid = (b_pad // tb,)

    cost = pl.CostEstimate(
        flops=int(2 * b_pad * H * (nw_pad + L + OUT_PAD)),
        transcendentals=int(b_pad * (H + OUT_PAD)),
        bytes_accessed=int(4 * (b_pad * (1 + L + OUT_PAD)
                                + nw_pad * H + (L + 1) * H
                                + (H + 1) * OUT_PAD)),
    )

    out = pl.pallas_call(
        _fused_mlp_kernel,
        out_shape=jax.ShapeDtypeStruct((b_pad, OUT_PAD), jnp.float32),
        grid=grid,
        in_specs=[
            pl.BlockSpec((tb, 1), lambda i: (i, 0)),          # word (batch-tiled)
            pl.BlockSpec((tb, L), lambda i: (i, 0)),          # prev_label (batch-tiled)
            pl.BlockSpec((nw_pad, H), lambda i: (0, 0)),      # emb_fold  (resident)
            pl.BlockSpec((L, H), lambda i: (0, 0)),           # w1b       (resident)
            pl.BlockSpec((1, H), lambda i: (0, 0)),           # b1        (resident)
            pl.BlockSpec((H, OUT_PAD), lambda i: (0, 0)),     # w2 padded (resident)
            pl.BlockSpec((1, OUT_PAD), lambda i: (0, 0)),     # b2 padded (resident)
        ],
        out_specs=pl.BlockSpec((tb, OUT_PAD), lambda i: (i, 0)),
        compiler_params=pltpu.CompilerParams(
            dimension_semantics=("parallel",)),
        cost_estimate=cost,
    )(word2, x2, prep["emb_fold"], prep["w1b"], prep["b1"],
      prep["w2"], prep["b2"])

    # Layout plumbing only: drop batch padding and the lane padding.
    return out[:B, :L]


def init_params(key, embedding_size, num_words, num_labels):
    k0, k1, k2, k3, k4 = jax.random.split(key, 5)
    hidden_dim = HIDDEN
    emb = jax.random.normal(k0, (num_words, embedding_size), jnp.float32)
    emb = emb.at[tag2idx['<PAD>']].set(0.0)   # padding_idx=0 -> zero row
    fan1 = embedding_size + num_labels
    params = {
        "embeddings": emb,
        "hidden_w": jax.random.uniform(k1, (fan1, hidden_dim), jnp.float32,
                                       -1.0 / np.sqrt(fan1), 1.0 / np.sqrt(fan1)),
        "hidden_b": jax.random.uniform(k2, (hidden_dim,), jnp.float32,
                                       -1.0 / np.sqrt(fan1), 1.0 / np.sqrt(fan1)),
        "output_w": jax.random.uniform(k3, (hidden_dim, num_labels), jnp.float32,
                                       -1.0 / np.sqrt(hidden_dim), 1.0 / np.sqrt(hidden_dim)),
        "output_b": jax.random.uniform(k4, (num_labels,), jnp.float32,
                                       -1.0 / np.sqrt(hidden_dim), 1.0 / np.sqrt(hidden_dim)),
    }
    return params


def _reference(word, prev_label, params):
    x1 = jnp.take(params["embeddings"], word, axis=0)
    x = jnp.concatenate([x1, prev_label], axis=1)
    h = x @ params["hidden_w"] + params["hidden_b"]
    h = h * jax.nn.sigmoid(h)
    logits = h @ params["output_w"] + params["output_b"]
    return jax.nn.softmax(logits, axis=1)


if __name__ == "__main__":
    embedding_size = 32
    num_words = 16
    num_labels = len(tag2idx)   # 5
    dropout_p = 0.1             # dropout is unused in forward (eval semantics)

    key = jax.random.PRNGKey(0)
    kp, kw, kl = jax.random.split(key, 3)

    params = init_params(kp, embedding_size, num_words, num_labels)
    prep = prepare_inference_params(params)

    B = 8
    word = jax.random.randint(kw, (B,), 0, num_words, dtype=jnp.int32)
    prev_label = jax.nn.softmax(
        jax.random.normal(kl, (B, num_labels), jnp.float32), axis=1)

    y = random_init_embeddings_forward(word, prev_label, prep)
    y = jax.block_until_ready(y)

    y_ref = _reference(word, prev_label, params)
    np.testing.assert_allclose(np.asarray(y), np.asarray(y_ref),
                               rtol=2e-2, atol=2e-2)
    assert y.shape == (B, num_labels)
    print("KERNEL_OK")
</pallas_src>

<mosaic_0001>
module attributes {stable_mosaic.version = 11 : i64} {
  func.func @_fused_mlp_kernel(%arg0: i32, %arg1: memref<8x1xi32, #tpu.memory_space<vmem>>, %arg2: memref<8x5xf32, #tpu.memory_space<vmem>>, %arg3: memref<128x200xf32, #tpu.memory_space<vmem>>, %arg4: memref<5x200xf32, #tpu.memory_space<vmem>>, %arg5: memref<1x200xf32, #tpu.memory_space<vmem>>, %arg6: memref<200x128xf32, #tpu.memory_space<vmem>>, %arg7: memref<1x128xf32, #tpu.memory_space<vmem>>, %arg8: memref<8x128xf32, #tpu.memory_space<vmem>>) attributes {dimension_semantics = [#tpu.dimension_semantics<parallel>], iteration_bounds = array<i64: 1>, scalar_prefetch = 0 : i64, scratch_operands = 0 : i64, tpu.core_type = #tpu.core_type<tc>, window_params = [{transform_indices = @transform_0, window_bounds = array<i64: 8, 1>}, {transform_indices = @transform_1, window_bounds = array<i64: 8, 5>}, {pipeline_mode = #tpu.pipeline_mode<synchronous>, transform_indices = @transform_2, window_bounds = array<i64: 128, 200>}, {pipeline_mode = #tpu.pipeline_mode<synchronous>, transform_indices = @transform_3, window_bounds = array<i64: 5, 200>}, {pipeline_mode = #tpu.pipeline_mode<synchronous>, transform_indices = @transform_4, window_bounds = array<i64: 1, 200>}, {pipeline_mode = #tpu.pipeline_mode<synchronous>, transform_indices = @transform_5, window_bounds = array<i64: 200, 128>}, {pipeline_mode = #tpu.pipeline_mode<synchronous>, transform_indices = @transform_6, window_bounds = array<i64: 1, 128>}, {transform_indices = @transform_7, window_bounds = array<i64: 8, 128>}]} {
    %c0 = arith.constant 0 : index
    %c0_0 = arith.constant 0 : index
    %0 = vector.load %arg1[%c0, %c0_0] : memref<8x1xi32, #tpu.memory_space<vmem>>, vector<8x1xi32>
    %1 = tpu.iota {dimensions = array<i32: 1>} : vector<8x128xi32>
    %2 = vector.broadcast %0 : vector<8x1xi32> to vector<8x128xi32>
    %3 = arith.cmpi eq, %1, %2 : vector<8x128xi32>
    %4 = arith.extui %3 : vector<8x128xi1> to vector<8x128xi32>
    %5 = arith.sitofp %4 : vector<8x128xi32> to vector<8x128xf32>
    %c0_1 = arith.constant 0 : index
    %c0_2 = arith.constant 0 : index
    %6 = vector.load %arg3[%c0_1, %c0_2] : memref<128x200xf32, #tpu.memory_space<vmem>>, vector<128x200xf32>
    %cst = arith.constant dense<0.000000e+00> : vector<8x200xf32>
    %7 = tpu.matmul %5, %6, %cst {dimension_numbers = #tpu.dot_dimension_numbers<[1], [0], [0], [1], [0, 0, 1, 1], [], []>} : vector<8x128xf32>, vector<128x200xf32>, vector<8x200xf32> -> vector<8x200xf32>
    %c0_3 = arith.constant 0 : index
    %c0_4 = arith.constant 0 : index
    %8 = vector.load %arg2[%c0_3, %c0_4] : memref<8x5xf32, #tpu.memory_space<vmem>>, vector<8x5xf32>
    %c0_5 = arith.constant 0 : index
    %c0_6 = arith.constant 0 : index
    %9 = vector.load %arg4[%c0_5, %c0_6] : memref<5x200xf32, #tpu.memory_space<vmem>>, vector<5x200xf32>
    %cst_7 = arith.constant dense<0.000000e+00> : vector<8x200xf32>
    %10 = tpu.matmul %8, %9, %cst_7 {dimension_numbers = #tpu.dot_dimension_numbers<[1], [0], [0], [1], [0, 0, 1, 1], [], []>} : vector<8x5xf32>, vector<5x200xf32>, vector<8x200xf32> -> vector<8x200xf32>
    %11 = arith.addf %7, %10 : vector<8x200xf32>
    %c0_8 = arith.constant 0 : index
    %c0_9 = arith.constant 0 : index
    %12 = vector.load %arg5[%c0_8, %c0_9] : memref<1x200xf32, #tpu.memory_space<vmem>>, vector<1x200xf32>
    %13 = vector.broadcast %12 : vector<1x200xf32> to vector<8x200xf32>
    %14 = arith.addf %11, %13 : vector<8x200xf32>
    %15 = arith.negf %14 : vector<8x200xf32>
    %16 = math.exp %15 : vector<8x200xf32>
    %cst_10 = arith.constant 1.000000e+00 : f32
    %17 = vector.broadcast %cst_10 : f32 to vector<8x200xf32>
    %18 = arith.addf %17, %16 : vector<8x200xf32>
    %19 = arith.divf %17, %18 : vector<8x200xf32>
    %20 = arith.mulf %14, %19 : vector<8x200xf32>
    %c0_11 = arith.constant 0 : index
    %c0_12 = arith.constant 0 : index
    %21 = vector.load %arg6[%c0_11, %c0_12] : memref<200x128xf32, #tpu.memory_space<vmem>>, vector<200x128xf32>
    %cst_13 = arith.constant dense<0.000000e+00> : vector<8x128xf32>
    %22 = tpu.matmul %20, %21, %cst_13 {dimension_numbers = #tpu.dot_dimension_numbers<[1], [0], [0], [1], [0, 0, 1, 1], [], []>} : vector<8x200xf32>, vector<200x128xf32>, vector<8x128xf32> -> vector<8x128xf32>
    %c0_14 = arith.constant 0 : index
    %c0_15 = arith.constant 0 : index
    %23 = vector.load %arg7[%c0_14, %c0_15] : memref<1x128xf32, #tpu.memory_space<vmem>>, vector<1x128xf32>
    %24 = vector.broadcast %23 : vector<1x128xf32> to vector<8x128xf32>
    %25 = arith.addf %22, %24 : vector<8x128xf32>
    %cst_16 = arith.constant dense<0xFF800000> : vector<8xf32>
    %26 = vector.multi_reduction <maximumf>, %25, %cst_16 [1] : vector<8x128xf32> to vector<8xf32>
    %27 = vector.shape_cast %26 : vector<8xf32> to vector<8x1xf32>
    %28 = vector.broadcast %27 : vector<8x1xf32> to vector<8x128xf32>
    %29 = arith.subf %25, %28 : vector<8x128xf32>
    %30 = math.exp %29 : vector<8x128xf32>
    %cst_17 = arith.constant dense<0.000000e+00> : vector<8xf32>
    %31 = vector.multi_reduction <add>, %30, %cst_17 [1] : vector<8x128xf32> to vector<8xf32>
    %32 = vector.shape_cast %31 : vector<8xf32> to vector<8x1xf32>
    %33 = tpu.reciprocal %32 {approx = true} : vector<8x1xf32> -> vector<8x1xf32>
    %34 = vector.broadcast %33 : vector<8x1xf32> to vector<8x128xf32>
    %35 = arith.mulf %30, %34 : vector<8x128xf32>
    %c0_18 = arith.constant 0 : index
    %c0_19 = arith.constant 0 : index
    %36 = vector.load %arg8[%c0_18, %c0_19] : memref<8x128xf32, #tpu.memory_space<vmem>>, vector<8x128xf32>
    tpu.vector_store %arg8[%c0_18, %c0_19], %35 {strides = array<i32>} : memref<8x128xf32, #tpu.memory_space<vmem>>, vector<8x128xf32>,
    return
  }
  func.func @transform_0(%arg0: i32) -> (i32, i32) {
    %c0_i32 = arith.constant 0 : i32
    %c0_i32_0 = arith.constant 0 : i32
    return %arg0, %c0_i32 : i32, i32
  }
  func.func @transform_1(%arg0: i32) -> (i32, i32) {
    %c0_i32 = arith.constant 0 : i32
    %c0_i32_0 = arith.constant 0 : i32
    return %arg0, %c0_i32 : i32, i32
  }
  func.func @transform_2(%arg0: i32) -> (i32, i32) {
    %c0_i32 = arith.constant 0 : i32
    %c0_i32_0 = arith.constant 0 : i32
    %c0_i32_1 = arith.constant 0 : i32
    return %c0_i32, %c0_i32_0 : i32, i32
  }
  func.func @transform_3(%arg0: i32) -> (i32, i32) {
    %c0_i32 = arith.constant 0 : i32
    %c0_i32_0 = arith.constant 0 : i32
    %c0_i32_1 = arith.constant 0 : i32
    return %c0_i32, %c0_i32_0 : i32, i32
  }
  func.func @transform_4(%arg0: i32) -> (i32, i32) {
    %c0_i32 = arith.constant 0 : i32
    %c0_i32_0 = arith.constant 0 : i32
    %c0_i32_1 = arith.constant 0 : i32
    return %c0_i32, %c0_i32_0 : i32, i32
  }
  func.func @transform_5(%arg0: i32) -> (i32, i32) {
    %c0_i32 = arith.constant 0 : i32
    %c0_i32_0 = arith.constant 0 : i32
    %c0_i32_1 = arith.constant 0 : i32
    return %c0_i32, %c0_i32_0 : i32, i32
  }
  func.func @transform_6(%arg0: i32) -> (i32, i32) {
    %c0_i32 = arith.constant 0 : i32
    %c0_i32_0 = arith.constant 0 : i32
    %c0_i32_1 = arith.constant 0 : i32
    return %c0_i32, %c0_i32_0 : i32, i32
  }
  func.func @transform_7(%arg0: i32) -> (i32, i32) {
    %c0_i32 = arith.constant 0 : i32
    %c0_i32_0 = arith.constant 0 : i32
    return %arg0, %c0_i32 : i32, i32
  }
}

</mosaic_0001>

<bundles_post_ra>
// kernel: tpu_custom_call.1
= control target key start
LH: loop header
LB: loop body
LE: loop exit
PB: predicated region body
PF: predicated region fallthrough
CT: control target
= control target key end

     0   :  { %vm75_vm0 = vcmask 1044480   ;;  %v503_v2 = vmov 0   ;;  %vm71_vm1 = vcmask 39936   ;;  %v504_v10 = vmov 0.0   ;;  %s764_s0 = inlined_call_operand.vmem [shape: s32[8,1], index: 0, kind: input, shape index: {}]   ;;  %s765_s1 = inlined_call_operand.vmem [shape: f32[8,5], index: 1, kind: input, shape index: {}]   ;;  %s766_s2 = inlined_call_operand.vmem [shape: f32[128,200], index: 2, kind: input, shape index: {}]   ;;  %s767_s3 = inlined_call_operand.vmem [shape: f32[5,200], index: 3, kind: input, shape index: {}]   ;;  %s768_s4 = inlined_call_operand.vmem [shape: f32[1,200], index: 4, kind: input, shape index: {}]   ;;  %s769_s5 = inlined_call_operand.vmem [shape: f32[200,128], index: 5, kind: input, shape index: {}]   ;;  %s770_s6 = inlined_call_operand.vmem [shape: f32[1,128], index: 6, kind: input, shape index: {}]   ;;  %s771_s7 = inlined_call_operand.hbm [shape: f32[8,128], index: 7, kind: output, shape index: {}]  }
   0x1   :  { %v27_v0 = vld [vmem:[%s764_s0] sm:$0xff]  ;;  %v70_v1 = vld [vmem:[%s767_s3 + $0x8] sm:$0x1f]  ;;  %466 = vset.pattern.permute.xlu0 %v503_v2  ;;  %v39_v5 = vld [vmem:[%s766_s2 + $0x18] sm:$0xff]  ;;  %146 = vmatprep.mubr.f32.mxu0 %v504_v10  ;;  %v505_v23 = vmov 0.0|0.0  }
   0x2   :  { %383 = vmatprep.subr.msk.mxu0 %vm75_vm0, %v70_v1  ;;  %v69_v3 = vld [vmem:[%s767_s3] sm:$0x1f]  ;;  %v37_v4 = vld [vmem:[%s766_s2 + $0x8] sm:$0xff]  ;;  %31 = vperm.xlu0 %466, %v27_v0   ;;  %v38_v9 = vld [vmem:[%s766_s2 + $0x10] sm:$0xff] }
   0x3   :  { %384 = vmatpush1.msk.msra.mxu0 %vm75_vm0, %v69_v3  ;;  %v391_v6 = vpack.c.bf16 %v39_v5, %v37_v4  ;;  %v68_v7 = vld [vmem:[%s765_s1] sm:$0xff]  ;;  %v41_v12 = vld [vmem:[%s766_s2 + $0x28] sm:$0xff]  ;;  %v43_v13 = vld [vmem:[%s766_s2 + $0x38] sm:$0xff]  ;;  %423 = vmatprep.subr.bf16.mxu1 %v505_v23 }
   0x4   :  { %v36_v8 = vld [vmem:[%s766_s2] sm:$0xff]  ;;  %385 = vmatmul.mubr.msk.f32.vlgmr.msra.gmra.mrb[0].mxu0 %vm71_vm1, %v68_v7  ;;  %v395_v15 = vpack.c.bf16 %v43_v13, %v41_v12  ;;  %v42_v16 = vld [vmem:[%s766_s2 + $0x30] sm:$0xff]  ;;  %v45_v17 = vld [vmem:[%s766_s2 + $0x48] sm:$0xff] }
   0x5   :  { %v393_v11 = vpack.c.bf16 %v38_v9, %v36_v8  ;;  %v40_v14 = vld [vmem:[%s766_s2 + $0x20] sm:$0xff]  ;;  %392 = vmatprep.subr.bf16.mxu0 %v391_v6  ;;  %v47_v18 = vld [vmem:[%s766_s2 + $0x58] sm:$0xff]  ;;  %217 = vmatprep.mubr.f32.mxu0 %v504_v10  ;;  %v46_v22 = vld [vmem:[%s766_s2 + $0x50] sm:$0xff] }
   0x6   :  { %v397_v19 = vpack.c.bf16 %v42_v16, %v40_v14  ;;  %v399_v20 = vpack.c.bf16 %v47_v18, %v45_v17  ;;  %v44_v21 = vld [vmem:[%s766_s2 + $0x40] sm:$0xff]  ;;  %v49_v24 = vld [vmem:[%s766_s2 + $0x68] sm:$0xff]  ;;  %v51_v25 = vld [vmem:[%s766_s2 + $0x78] sm:$0xff] }
   0x7   :  { %394 = vmatpush1.bf16.msra.mxu0 %v393_v11  ;;  %v401_v26 = vpack.c.bf16 %v46_v22, %v44_v21  ;;  %v403_v27 = vpack.c.bf16 %v51_v25, %v49_v24  ;;  %v48_v28 = vld [vmem:[%s766_s2 + $0x60] sm:$0xff]  ;;  %v50_v29 = vld [vmem:[%s766_s2 + $0x70] sm:$0xff]  ;;  %v53_v30 = vld [vmem:[%s766_s2 + $0x88] sm:$0xff] }
   0x8   :  { %396 = vmatprep.subr.bf16.mxu0 %v395_v15  ;;  %v55_v31 = vld [vmem:[%s766_s2 + $0x98] sm:$0xff]  ;;  %v252_v32 = vld [vmem:[%s769_s5] sm:$0xff]  ;;  %v253_v33 = vld [vmem:[%s769_s5 + $0x8] sm:$0xff]  ;;  %v405_v34 = vpack.c.bf16 %v50_v29, %v48_v28 }
   0x9   :  { %v424_v35 = vpack.c.bf16 %v253_v33, %v252_v32  ;;  %v254_v36 = vld [vmem:[%s769_s5 + $0x10] sm:$0xff]  ;;  %v255_v37 = vld [vmem:[%s769_s5 + $0x18] sm:$0xff]  ;;  %v407_v38 = vpack.c.bf16 %v55_v31, %v53_v30  ;;  %v52_v39 = vld [vmem:[%s766_s2 + $0x80] sm:$0xff] }
   0xa   :  { %v54_v40 = vld [vmem:[%s766_s2 + $0x90] sm:$0xff]  ;;  %v57_v41 = vld [vmem:[%s766_s2 + $0xa8] sm:$0xff]  ;;  %v59_v42 = vld [vmem:[%s766_s2 + $0xb8] sm:$0xff]  ;;  %v427_v43 = vpack.c.bf16 %v255_v37, %v254_v36 }
   0xb   :  { %398 = vmatpush1.bf16.msra.mxu0 %v397_v19  ;;  %425 = vmatpush1.bf16.msra.mxu1 %v424_v35 }
   0xc   :  { %400 = vmatprep.subr.bf16.mxu0 %v399_v20 }
   0xf   :  { %402 = vmatpush1.bf16.msra.mxu0 %v401_v26 }
  0x10   :  { %404 = vmatprep.subr.bf16.mxu0 %v403_v27 }
  0x11   :  { %12 = vsyncpa [#allocation3], 0  ;;  %426 = vmatprep.subr.bf16.mxu1 %v505_v23  ;;  %v256_v44 = vld [vmem:[%s769_s5 + $0x20] sm:$0xff]  ;;  %v257_v45 = vld [vmem:[%s769_s5 + $0x28] sm:$0xff]  ;;  %v409_v46 = vpack.c.bf16 %v54_v40, %v52_v39  ;;  %v411_v47 = vpack.c.bf16 %v59_v42, %v57_v41  ;;  %v28_v3 = vlaneseq  ;;  %v506_v6 = vmov 1.0   ;;  %s507_s17 = smov [#allocation2]  }
  0x12   :  { %v56_v48 = vld [vmem:[%s766_s2 + $0xa0] sm:$0xff]  ;;  %v58_v49 = vld [vmem:[%s766_s2 + $0xb0] sm:$0xff]  ;;  %v61_v50 = vld [vmem:[%s766_s2 + $0xc8] sm:$0xff]  ;;  %428 = vmatpush1.bf16.msra.mxu1 %v427_v43  ;;  %v430_v52 = vpack.c.bf16 %v257_v45, %v256_v44  ;;  %vm284_vm3 = vcmask 588800   ;;  %s374_s18 = sshll.u32 %s507_s17, 4  ;;  %s375_s18 = int_to_ptr.vmem [resolvable:$true] %s374_s18 }
  0x13   :  { %406 = vmatpush1.bf16.msra.mxu0 %v405_v34  ;;  %v63_v51 = vld [vmem:[%s766_s2 + $0xd8] sm:$0xff]  ;;  %429 = vmatprep.subr.bf16.mxu1 %v505_v23  ;;  %v258_v53 = vld [vmem:[%s769_s5 + $0x30] sm:$0xff]  ;;  %v413_v55 = vpack.c.bf16 %v58_v49, %v56_v48  ;;  %v60_v57 = vld [vmem:[%s766_s2 + $0xc0] sm:$0xff]  ;;  %v29_v4 = vand.u32 127, %v28_v3  ;;  %v227_v34 = vshrl.u32 %v28_v3, 7  ;;  %s479_s1 = scalar_lea.vmem %s375_s18, 128  ;;  %p484_p1 = scmp.lt.s32.totalorder %s375_s18, %s375_s18 }
  0x14   :  { %408 = vmatprep.subr.bf16.mxu0 %v407_v38  ;;  %v259_v54 = vld [vmem:[%s769_s5 + $0x38] sm:$0xff]  ;;  %v415_v56 = vpack.c.bf16 %v63_v51, %v61_v50  ;;  %v62_v58 = vld [vmem:[%s766_s2 + $0xd0] sm:$0xff]  ;;  %v65_v59 = vld [vmem:[%s766_s2 + $0xe8] sm:$0xff]  ;;  %p480_p0 = scmp.ne.s32.totalorder %s375_s18, %s479_s1  ;;  %p485_p2 = scmp.lt.s32.totalorder %s479_s1, %s479_s1 }
  0x15   :  { %v67_v60 = vld [vmem:[%s766_s2 + $0xf8] sm:$0xff]  ;;  %v433_v61 = vpack.c.bf16 %v259_v54, %v258_v53  ;;  %v417_v62 = vpack.c.bf16 %v62_v58, %v60_v57  ;;  %v64_v0 = vld [vmem:[%s766_s2 + $0xe0] sm:$0xff]  ;;  %v66_v1 = vld [vmem:[%s766_s2 + $0xf0] sm:$0xff]  ;;  %v228_v35 = vsub.s32 0, %v227_v34  ;;  %v232_v36 = vsub.s32 1, %v227_v34 }
  0x16   :  { %431 = vmatpush1.bf16.msra.mxu1 %v430_v52  ;;  %v419_v63 = vpack.c.bf16 %v67_v60, %v65_v59  ;;  %v421_v2 = vpack.c.bf16 %v66_v1, %v64_v0  ;;  %v260_v7 = vld [vmem:[%s769_s5 + $0x40] sm:$0xff]  ;;  %v261_v8 = vld [vmem:[%s769_s5 + $0x48] sm:$0xff]  ;;  %v262_v11 = vld [vmem:[%s769_s5 + $0x50] sm:$0xff]  ;;  %p486_p3 = por %p485_p2, %p484_p1 }
  0x17   :  { %410 = vmatpush1.bf16.msra.mxu0 %v409_v46  ;;  %432 = vmatprep.subr.bf16.mxu1 %v505_v23  ;;  %v436_v9 = vpack.c.bf16 %v261_v8, %v260_v7  ;;  %v263_v12 = vld [vmem:[%s769_s5 + $0x58] sm:$0xff]  ;;  %v264_v14 = vld [vmem:[%s769_s5 + $0x60] sm:$0xff]  ;;  %v265_v15 = vld [vmem:[%s769_s5 + $0x68] sm:$0xff] }
  0x18   :  { %412 = vmatprep.subr.bf16.mxu0 %v411_v47  ;;  %v439_v13 = vpack.c.bf16 %v263_v12, %v262_v11  ;;  %v442_v16 = vpack.c.bf16 %v265_v15, %v264_v14  ;;  %v266_v17 = vld [vmem:[%s769_s5 + $0x70] sm:$0xff]  ;;  %v267_v18 = vld [vmem:[%s769_s5 + $0x78] sm:$0xff]  ;;  %v268_v20 = vld [vmem:[%s769_s5 + $0x80] sm:$0xff]  ;;  %p487_p4 = pnand %p486_p3, %p480_p0 }
  0x19   :  { %v445_v19 = vpack.c.bf16 %v267_v18, %v266_v17  ;;  %v269_v21 = vld [vmem:[%s769_s5 + $0x88] sm:$0xff]  ;;  %v270_v24 = vld [vmem:[%s769_s5 + $0x90] sm:$0xff]  ;;  %v271_v25 = vld [vmem:[%s769_s5 + $0x98] sm:$0xff] }
  0x1a   :  { %434 = vmatpush1.bf16.msra.mxu1 %v433_v61  ;;  %v448_v22 = vpack.c.bf16 %v269_v21, %v268_v20  ;;  %v451_v26 = vpack.c.bf16 %v271_v25, %v270_v24  ;;  %v272_v27 = vld [vmem:[%s769_s5 + $0xa0] sm:$0xff]  ;;  %v273_v28 = vld [vmem:[%s769_s5 + $0xa8] sm:$0xff]  ;;  %v274_v30 = vld [vmem:[%s769_s5 + $0xb0] sm:$0xff] }
  0x1b   :  { %414 = vmatpush1.bf16.msra.mxu0 %v413_v55  ;;  %435 = vmatprep.subr.bf16.mxu1 %v505_v23  ;;  %v454_v29 = vpack.c.bf16 %v273_v28, %v272_v27  ;;  %v275_v31 = vld [vmem:[%s769_s5 + $0xb8] sm:$0xff]  ;;  %v276_v33 = vld [vmem:[%s769_s5 + $0xc0] sm:$0xff] }
  0x1c   :  { %416 = vmatprep.subr.bf16.mxu0 %v415_v56  ;;  %v457_v32 = vpack.c.bf16 %v275_v31, %v274_v30  ;;  %v389_v52 = vld [vmem:[%s770_s6] ss:$0 sm:$0xff] }
  0x1e   :  { %437 = vmatpush1.bf16.msra.mxu1 %v436_v9 }
  0x1f   :  { %418 = vmatpush1.bf16.msra.mxu0 %v417_v62  ;;  %438 = vmatprep.subr.bf16.mxu1 %v505_v23 }
  0x20   :  { %420 = vmatprep.subr.bf16.mxu0 %v419_v63 }
  0x22   :  { %440 = vmatpush1.bf16.msra.mxu1 %v439_v13 }
  0x23   :  { %422 = vmatpush1.bf16.msra.mxu0 %v421_v2  ;;  %441 = vmatprep.subr.bf16.mxu1 %v505_v23 }
  0x26   :  { %443 = vmatpush1.bf16.msra.mxu1 %v442_v16 }
  0x27   :  { %444 = vmatprep.subr.bf16.mxu1 %v505_v23 }
  0x2a   :  { %446 = vmatpush1.bf16.msra.mxu1 %v445_v19 }
  0x2b   :  { %447 = vmatprep.subr.bf16.mxu1 %v505_v23 }
  0x2e   :  { %449 = vmatpush1.bf16.msra.mxu1 %v448_v22 }
  0x2f   :  { %450 = vmatprep.subr.bf16.mxu1 %v505_v23 }
  0x32   :  { %452 = vmatpush1.bf16.msra.mxu1 %v451_v26 }
  0x33   :  { %453 = vmatprep.subr.bf16.mxu1 %v505_v23 }
  0x36   :  { %455 = vmatpush1.bf16.msra.mxu1 %v454_v29 }
  0x37   :  { %456 = vmatprep.subr.bf16.mxu1 %v505_v23  ;;  %v224_v23 = vld [vmem:[%s768_s4] sm:$0x3] }
  0x38   :  { %v229_v37 = vrot.slane %v224_v23, %v228_v35  ;;  %v233_v38 = vrot.slane %v224_v23, %v232_v36 }
  0x3a   :  { %458 = vmatpush1.bf16.msra.mxu1 %v457_v32 }
  0x3b   :  { %336 = vmatprep.subr.mxu1 %v504_v10 }
  0x3e   :  { %337 = vmatpush1.msra.mxu1 %v276_v33 }
  0x81   :  { %v32_v5 = vpop.permute.xlu0 %31 }
  0x82   :  { %vm33_vm2 = vcmp.eq.s32.totalorder %v29_v4, %v32_v5 }
  0x83   :  { %386 = vmatmul.mubr.msk.f32.vlgmr.msra.gmra.mrb[0].mxu0 %vm33_vm2, %v506_v6 }
 0x156   :  { %v219_v39 = vpop.f32.mrb[0].mxu0 }
 0x157   :  { %v236_v40 = vadd.f32 %v229_v37, %v219_v39  ;;  %v221_v41 = vpop.f32.mrb[1].mxu0 }
 0x158   :  { %v237_v42 = vadd.f32 %v233_v38, %v221_v41 }
 0x159   :  { %v387_v43 = vmul.f32 -1.442695, %v236_v40 }
 0x15a   :  { %v388_v10 = vmul.f32 -1.442695, %v237_v42 }
 0x15b   :  { %467 = vpow2.f32 %v387_v43 }
 0x15c   :  { %469 = vpow2.f32 %v388_v10 }
 0x165   :  { %v468_v44 = vpop.eup %467 }
 0x166   :  { %v470_v45 = vpop.eup %469  ;;  %v244_v46 = vadd.f32 1.0, %v468_v44 }
 0x167   :  { %v245_v47 = vadd.f32 1.0, %v470_v45 }
 0x168   :  { %471 = vrcp.f32 %v244_v46 }
 0x169   :  { %473 = vrcp.f32 %v245_v47 }
 0x172   :  { %v472_v48 = vpop.eup %471 }
 0x173   :  { %v474_v49 = vpop.eup %473  ;;  %v250_v51 = vmul.f32 %v472_v48, %v236_v40 }
 0x174   :  { %v251_v50 = vmul.f32 %v474_v49, %v237_v42 }
 0x176   :  { %390 = vmatprep.mubr.msk.f32.mxu1 %vm284_vm3, %v251_v50 }
 0x177   :  { %353 = vmatmul.mubr.f32.vlgmr.msra.gmra.mrb[0].mxu1 %v250_v51 }
 0x24a   :  { %v354_v53 = vpop.f32.mrb[0].mxu1 }
 0x24b   :  { %v355_v54 = vadd.f32 %v389_v52, %v354_v53  ;;  %v356_v55 = vpop.f32.mrb[1].mxu1 }
 0x24d   :  { %358 = vmax.xlane.f32.xlu0 %v355_v54 }
 0x2da   :  { %v359_v56 = vpop.xlane.xlu0 %358 }
 0x2db   :  { %v360_v57 = vsub.f32 %v355_v54, %v359_v56 }
 0x2dd   :  { %v361_v58 = vmul.f32 1.442695, %v360_v57 }
 0x2df   :  { %475 = vpow2.f32 %v361_v58 }
 0x2e9   :  { %v476_v59 = vpop.eup %475 }
 0x2ea   :  { %363 = vadd.xlane.f32.xlu1 %v476_v59 }
 0x377   :  { %v364_v60 = vpop.xlane.xlu1 %363 }
 0x378   :  { %477 = vrcp.f32 %v364_v60 }
 0x382   :  { %v478_v61 = vpop.eup %477 }
 0x383   :  { %v366_v62 = vmul.f32 %v478_v61, %v476_v59 }
 0x385   :  { %367 = vst [vmem:[#allocation2] sm:$0xff] %v366_v62 }
 0x386   :  { %490 = shalt.err (!%p487_p4)
}
 0x387   :  { %s491_s20 = scalar_lea.hbm %s771_s7, 128 }
 0x388   :  { %p492_p5 = scmp.ne.s32.totalorder %s771_s7, %s491_s20  ;;  %p495_p6 = scmp.lt.u32.totalorder %s491_s20, %s771_s7 }
 0x38a   :  { %p497_p7 = pnand %p495_p6, %p492_p5 }
 0x38c   :  { %500 = shalt.err (!%p497_p7)
}
 0x38d   :  { %377 = dma.vmem_to_hbm [thread:$0]  %s375_s18, 128, %s771_s7, [#allocation3]  }
 0x38e   :  { %501 = dma.done.wait [#allocation3], 128  }
 0x38f   :  { %502 = vsyncadd [#allocation3], 4294967168 }
 0x390   :  { %381 = vsyncpa [#allocation3], 1 }

</bundles_post_ra>
